<compile_context>
chip_gen: v7x
topology: tpu7x:2x2x1
jax: 0.10.0
libtpu: 0.0.40
codegen_flags: <defaults>
</compile_context>

<pallas_src>
import functools

import jax
import jax.numpy as jnp
from jax import lax
from jax.experimental import pallas as pl
from jax.experimental.pallas import tpu as pltpu


def _round_up(v, m):
    return ((v + m - 1) // m) * m


def encoder_kernel(x_ref, a_ref, pool_ref,
                   w1_ref, b1_ref, w2_ref, b2_ref, gamma_ref, beta_ref,
                   y_ref, pooled_ref, h_ref,
                   *, n_valid, n_pad):
    """One grid step == one encoder layer.  h_ref carries activations."""
    layer = pl.program_id(0)

    # Layer 0 reads the (padded) input features into the carried activation.
    @pl.when(layer == 0)
    def _():
        h_ref[...] = x_ref[...]

    h_in = h_ref[...]

    # --- GIN aggregation: (A + (1+eps) I) @ h  (bf16 MXU, f32 accumulate) ---
    agg = jnp.dot(a_ref[...], h_in.astype(jnp.bfloat16),
                  preferred_element_type=jnp.float32)

    # --- GIN MLP: Linear -> ReLU -> Linear ---
    z = jnp.dot(agg.astype(jnp.bfloat16), w1_ref[0],
                preferred_element_type=jnp.float32) + b1_ref[0]
    z = jnp.maximum(z, 0.0)
    z = jnp.dot(z.astype(jnp.bfloat16), w2_ref[0],
                preferred_element_type=jnp.float32) + b2_ref[0]

    # Outer F.relu in Encoder.forward
    z = jnp.maximum(z, 0.0)

    # --- BatchNorm1d (training mode, biased variance) over the REAL rows ---
    # One pass: sum and sum-of-squares; fold gamma*rsqrt into scale, and
    # beta - mean*scale into shift (single FMA-style apply).
    row_ok = (lax.broadcasted_iota(jnp.int32, (n_pad, 1), 0)
              < n_valid).astype(jnp.float32)
    zm = z * row_ok
    inv_n = jnp.float32(1.0 / n_valid)
    mean = jnp.sum(zm, axis=0, keepdims=True) * inv_n
    ex2 = jnp.sum(zm * zm, axis=0, keepdims=True) * inv_n
    var = jnp.maximum(ex2 - mean * mean, 0.0)
    scale = gamma_ref[0] * lax.rsqrt(var + 1e-5)
    shift = beta_ref[0] - mean * scale
    h_new = z * scale + shift

    # Carry to next layer, emit this layer's node features and pooled sums.
    h_ref[...] = h_new
    y_ref[...] = h_new
    # global_add_pool as P @ h (P is padded to 8 lane-dense rows, bf16 operand).
    pooled_ref[...] = jnp.dot(pool_ref[...], h_new.astype(jnp.bfloat16),
                              preferred_element_type=jnp.float32)


def init_encoder_params(key, in_channels, hidden_channels, num_layers):
    """Deterministic synthetic parameters matching the PyTorch module's shapes."""
    params = []
    for i in range(num_layers):
        c_in = in_channels if i == 0 else hidden_channels
        key, k1, k2, k3, k4 = jax.random.split(key, 5)
        w1 = (jax.random.normal(k1, (c_in, hidden_channels), jnp.float32)
              * (1.0 / jnp.sqrt(c_in)))
        b1 = jax.random.normal(k2, (1, hidden_channels), jnp.float32) * 0.01
        w2 = (jax.random.normal(k3, (hidden_channels, hidden_channels), jnp.float32)
              * (1.0 / jnp.sqrt(hidden_channels)))
        b2 = jax.random.normal(k4, (1, hidden_channels), jnp.float32) * 0.01
        gamma = jnp.ones((1, hidden_channels), jnp.float32)   # BatchNorm1d weight
        beta = jnp.zeros((1, hidden_channels), jnp.float32)   # BatchNorm1d bias
        params.append((w1, b1, w2, b2, gamma, beta))
    return params


def encoder_forward(x, edge_index, batch, params, num_graphs, eps=0.0):
    """Pallas-backed equivalent of Encoder.forward. Returns (xpool_cat, xs_cat)."""
    n, c_in = x.shape
    hidden = params[0][0].shape[1]
    num_layers = len(params)

    # Padded, lane-dense working shapes.
    d_pad = max(_round_up(c_in, 128), _round_up(hidden, 128))   # common feature width
    n_pad = _round_up(n, 8)
    g_pad = _round_up(num_graphs, 8)

    # --- Dense GIN operator: A_hat[i, j] = #edges j->i, plus (1+eps) I. ---
    src, dst = edge_index[0], edge_index[1]
    a = jnp.zeros((n, n), jnp.float32).at[dst, src].add(1.0)
    a = a + (1.0 + eps) * jnp.eye(n, dtype=jnp.float32)
    a_p = jnp.zeros((n_pad, n_pad), jnp.bfloat16).at[:n, :n].set(a.astype(jnp.bfloat16))

    # --- Pooling matrix: P[g, i] = 1 iff node i belongs to graph g. ---
    pool = (jnp.arange(num_graphs, dtype=jnp.int32)[:, None]
            == batch[None, :]).astype(jnp.float32)
    pool_p = (jnp.zeros((g_pad, n_pad), jnp.bfloat16)
              .at[:num_graphs, :n].set(pool.astype(jnp.bfloat16)))

    # --- Padded input features. ---
    x_p = jnp.zeros((n_pad, d_pad), jnp.float32).at[:n, :c_in].set(
        x.astype(jnp.float32))

    # --- Stack per-layer parameters into (L, ...) arrays (zero padded). ---
    w1_s = jnp.zeros((num_layers, d_pad, d_pad), jnp.bfloat16)
    w2_s = jnp.zeros((num_layers, d_pad, d_pad), jnp.bfloat16)
    b1_s = jnp.zeros((num_layers, 1, d_pad), jnp.float32)
    b2_s = jnp.zeros((num_layers, 1, d_pad), jnp.float32)
    gm_s = jnp.zeros((num_layers, 1, d_pad), jnp.float32)
    bt_s = jnp.zeros((num_layers, 1, d_pad), jnp.float32)
    for l, (w1, b1, w2, b2, gamma, beta) in enumerate(params):
        ci = w1.shape[0]
        w1_s = w1_s.at[l, :ci, :hidden].set(w1.astype(jnp.bfloat16))
        w2_s = w2_s.at[l, :hidden, :hidden].set(w2.astype(jnp.bfloat16))
        b1_s = b1_s.at[l, :, :hidden].set(b1.reshape(1, hidden))
        b2_s = b2_s.at[l, :, :hidden].set(b2.reshape(1, hidden))
        gm_s = gm_s.at[l, :, :hidden].set(gamma.reshape(1, hidden))
        bt_s = bt_s.at[l, :, :hidden].set(beta.reshape(1, hidden))

    # --- VMEM budget / cost estimate (resident set + double buffering). ---
    per_step_blocks = (
        x_p.size * 4 + a_p.size * 2 + pool_p.size * 2          # resident inputs
        + 2 * d_pad * d_pad * 2                                 # W1, W2 blocks (bf16)
        + 4 * d_pad * 4                                         # b1, b2, gamma, beta
        + (n_pad + g_pad) * d_pad * 4                           # output blocks
    )
    scratch_bytes = n_pad * d_pad * 4
    vmem_limit = int(min(max(2 * per_step_blocks + scratch_bytes + (2 << 20),
                             8 << 20), 48 << 20))

    flops = num_layers * (2 * n_pad * n_pad * d_pad            # A_hat @ h
                          + 4 * n_pad * d_pad * d_pad          # two MLP matmuls
                          + 2 * g_pad * n_pad * d_pad)         # pooling
    bytes_accessed = int(x_p.size * 4 + a_p.size * 2 + pool_p.size * 2
                         + (w1_s.size + w2_s.size) * 2
                         + (b1_s.size + b2_s.size + gm_s.size + bt_s.size) * 4
                         + (n_pad + g_pad) * num_layers * d_pad * 4)
    cost = pl.CostEstimate(flops=flops,
                           transcendentals=num_layers * d_pad,
                           bytes_accessed=bytes_accessed)

    kernel = functools.partial(encoder_kernel, n_valid=n, n_pad=n_pad)

    grid_spec = pltpu.PrefetchScalarGridSpec(
        num_scalar_prefetch=0,
        grid=(num_layers,),
        in_specs=[
            pl.BlockSpec((n_pad, d_pad), lambda l: (0, 0)),        # x (resident)
            pl.BlockSpec((n_pad, n_pad), lambda l: (0, 0)),        # A_hat (resident)
            pl.BlockSpec((g_pad, n_pad), lambda l: (0, 0)),        # pool (resident)
            pl.BlockSpec((1, d_pad, d_pad), lambda l: (l, 0, 0)),  # W1[l]
            pl.BlockSpec((1, 1, d_pad), lambda l: (l, 0, 0)),      # b1[l]
            pl.BlockSpec((1, d_pad, d_pad), lambda l: (l, 0, 0)),  # W2[l]
            pl.BlockSpec((1, 1, d_pad), lambda l: (l, 0, 0)),      # b2[l]
            pl.BlockSpec((1, 1, d_pad), lambda l: (l, 0, 0)),      # gamma[l]
            pl.BlockSpec((1, 1, d_pad), lambda l: (l, 0, 0)),      # beta[l]
        ],
        out_specs=[
            pl.BlockSpec((n_pad, d_pad), lambda l: (0, l)),        # y slab for layer l
            pl.BlockSpec((g_pad, d_pad), lambda l: (0, l)),        # pooled slab
        ],
        scratch_shapes=[pltpu.VMEM((n_pad, d_pad), jnp.float32)],  # carried h
    )

    y_full, pooled_full = pl.pallas_call(
        kernel,
        out_shape=(
            jax.ShapeDtypeStruct((n_pad, num_layers * d_pad), jnp.float32),
            jax.ShapeDtypeStruct((g_pad, num_layers * d_pad), jnp.float32),
        ),
        grid_spec=grid_spec,
        compiler_params=pltpu.CompilerParams(
            dimension_semantics=("arbitrary",),   # layers carry h sequentially
            vmem_limit_bytes=vmem_limit,
        ),
        cost_estimate=cost,
    )(x_p, a_p, pool_p, w1_s, b1_s, w2_s, b2_s, gm_s, bt_s)

    # Strip padding and assemble the concatenated outputs (cheap wrapper slices).
    xs = [y_full[:n, l * d_pad:l * d_pad + hidden] for l in range(num_layers)]
    xpool = [pooled_full[:num_graphs, l * d_pad:l * d_pad + hidden]
             for l in range(num_layers)]
    return jnp.concatenate(xpool, axis=1), jnp.concatenate(xs, axis=1)


if __name__ == "__main__":
    # Small synthetic graph batch consistent with the module's forward:
    #   N=16 nodes, in_channels=8, hidden_channels=32, num_layers=3, 2 graphs.
    key = jax.random.PRNGKey(0)
    key, kx, ke = jax.random.split(key, 3)

    num_nodes = 16
    in_channels = 8
    hidden_channels = 32
    num_layers = 3
    num_graphs = 2
    num_edges = 40

    x = jax.random.normal(kx, (num_nodes, in_channels), jnp.float32)
    edge_index = jax.random.randint(ke, (2, num_edges), 0, num_nodes, jnp.int32)
    batch = jnp.concatenate([
        jnp.zeros((num_nodes // 2,), jnp.int32),
        jnp.ones((num_nodes - num_nodes // 2,), jnp.int32),
    ])

    params = init_encoder_params(key, in_channels, hidden_channels, num_layers)

    xpool_cat, xs_cat = encoder_forward(x, edge_index, batch, params, num_graphs)
    jax.block_until_ready((xpool_cat, xs_cat))

    assert xpool_cat.shape == (num_graphs, num_layers * hidden_channels)
    assert xs_cat.shape == (num_nodes, num_layers * hidden_channels)
    assert bool(jnp.all(jnp.isfinite(xpool_cat)))
    assert bool(jnp.all(jnp.isfinite(xs_cat)))
    print("KERNEL_OK")
</pallas_src>

<mosaic_0001>
module attributes {stable_mosaic.version = 11 : i64} {
  func.func @encoder_kernel(%arg0: i32, %arg1: memref<16x128xf32, #tpu.memory_space<vmem>>, %arg2: memref<16x16xbf16, #tpu.memory_space<vmem>>, %arg3: memref<8x16xbf16, #tpu.memory_space<vmem>>, %arg4: memref<1x128x128xbf16, #tpu.memory_space<vmem>>, %arg5: memref<1x1x128xf32, #tpu.memory_space<vmem>>, %arg6: memref<1x128x128xbf16, #tpu.memory_space<vmem>>, %arg7: memref<1x1x128xf32, #tpu.memory_space<vmem>>, %arg8: memref<1x1x128xf32, #tpu.memory_space<vmem>>, %arg9: memref<1x1x128xf32, #tpu.memory_space<vmem>>, %arg10: memref<16x128xf32, #tpu.memory_space<vmem>>, %arg11: memref<8x128xf32, #tpu.memory_space<vmem>>, %arg12: memref<16x128xf32, #tpu.memory_space<vmem>>) attributes {dimension_semantics = [#tpu.dimension_semantics<arbitrary>], iteration_bounds = array<i64: 3>, scalar_prefetch = 0 : i64, scratch_operands = 1 : i64, tpu.core_type = #tpu.core_type<tc>, window_params = [{pipeline_mode = #tpu.pipeline_mode<synchronous>, transform_indices = @transform_0, window_bounds = array<i64: 16, 128>}, {pipeline_mode = #tpu.pipeline_mode<synchronous>, transform_indices = @transform_1, window_bounds = array<i64: 16, 16>}, {pipeline_mode = #tpu.pipeline_mode<synchronous>, transform_indices = @transform_2, window_bounds = array<i64: 8, 16>}, {transform_indices = @transform_3, window_bounds = array<i64: 1, 128, 128>}, {transform_indices = @transform_4, window_bounds = array<i64: 1, 1, 128>}, {transform_indices = @transform_5, window_bounds = array<i64: 1, 128, 128>}, {transform_indices = @transform_6, window_bounds = array<i64: 1, 1, 128>}, {transform_indices = @transform_7, window_bounds = array<i64: 1, 1, 128>}, {transform_indices = @transform_8, window_bounds = array<i64: 1, 1, 128>}, {transform_indices = @transform_9, window_bounds = array<i64: 16, 128>}, {transform_indices = @transform_10, window_bounds = array<i64: 8, 128>}]} {
    %c0_i32 = arith.constant 0 : i32
    %0 = arith.cmpi eq, %arg0, %c0_i32 : i32
    %1 = arith.extui %0 : i1 to i32
    %c0_i32_0 = arith.constant 0 : i32
    %2 = arith.cmpi ne, %1, %c0_i32_0 : i32
    scf.if %2 {
      %c0_41 = arith.constant 0 : index
      %c0_42 = arith.constant 0 : index
      %67 = vector.load %arg1[%c0_41, %c0_42] : memref<16x128xf32, #tpu.memory_space<vmem>>, vector<16x128xf32>
      %c0_43 = arith.constant 0 : index
      %c0_44 = arith.constant 0 : index
      %68 = vector.load %arg12[%c0_43, %c0_44] : memref<16x128xf32, #tpu.memory_space<vmem>>, vector<16x128xf32>
      tpu.vector_store %arg12[%c0_43, %c0_44], %67 {strides = array<i32>} : memref<16x128xf32, #tpu.memory_space<vmem>>, vector<16x128xf32>,
    } else {
    }
    %c0 = arith.constant 0 : index
    %c0_1 = arith.constant 0 : index
    %3 = vector.load %arg12[%c0, %c0_1] : memref<16x128xf32, #tpu.memory_space<vmem>>, vector<16x128xf32>
    %c0_2 = arith.constant 0 : index
    %c0_3 = arith.constant 0 : index
    %4 = vector.load %arg2[%c0_2, %c0_3] : memref<16x16xbf16, #tpu.memory_space<vmem>>, vector<16x16xbf16>
    %5 = arith.truncf %3 : vector<16x128xf32> to vector<16x128xbf16>
    %cst = arith.constant dense<0.000000e+00> : vector<16x128xf32>
    %6 = tpu.matmul %4, %5, %cst {dimension_numbers = #tpu.dot_dimension_numbers<[1], [0], [0], [1], [0, 0, 1, 1], [], []>} : vector<16x16xbf16>, vector<16x128xbf16>, vector<16x128xf32> -> vector<16x128xf32>
    %7 = arith.truncf %6 : vector<16x128xf32> to vector<16x128xbf16>
    %c0_4 = arith.constant 0 : index
    %c0_5 = arith.constant 0 : index
    %c0_6 = arith.constant 0 : index
    %8 = vector.load %arg4[%c0_4, %c0_5, %c0_6] : memref<1x128x128xbf16, #tpu.memory_space<vmem>>, vector<1x128x128xbf16>
    %9 = vector.shape_cast %8 : vector<1x128x128xbf16> to vector<128x128xbf16>
    %cst_7 = arith.constant dense<0.000000e+00> : vector<16x128xf32>
    %10 = tpu.matmul %7, %9, %cst_7 {dimension_numbers = #tpu.dot_dimension_numbers<[1], [0], [0], [1], [0, 0, 1, 1], [], []>} : vector<16x128xbf16>, vector<128x128xbf16>, vector<16x128xf32> -> vector<16x128xf32>
    %c0_8 = arith.constant 0 : index
    %c0_9 = arith.constant 0 : index
    %c0_10 = arith.constant 0 : index
    %11 = vector.load %arg5[%c0_8, %c0_9, %c0_10] : memref<1x1x128xf32, #tpu.memory_space<vmem>>, vector<1x1x128xf32>
    %12 = vector.shape_cast %11 : vector<1x1x128xf32> to vector<1x128xf32>
    %13 = vector.broadcast %12 : vector<1x128xf32> to vector<16x128xf32>
    %14 = arith.addf %10, %13 : vector<16x128xf32>
    %cst_11 = arith.constant 0.000000e+00 : f32
    %15 = vector.broadcast %cst_11 : f32 to vector<16x128xf32>
    %16 = arith.maximumf %14, %15 : vector<16x128xf32>
    %17 = arith.truncf %16 : vector<16x128xf32> to vector<16x128xbf16>
    %c0_12 = arith.constant 0 : index
    %c0_13 = arith.constant 0 : index
    %c0_14 = arith.constant 0 : index
    %18 = vector.load %arg6[%c0_12, %c0_13, %c0_14] : memref<1x128x128xbf16, #tpu.memory_space<vmem>>, vector<1x128x128xbf16>
    %19 = vector.shape_cast %18 : vector<1x128x128xbf16> to vector<128x128xbf16>
    %cst_15 = arith.constant dense<0.000000e+00> : vector<16x128xf32>
    %20 = tpu.matmul %17, %19, %cst_15 {dimension_numbers = #tpu.dot_dimension_numbers<[1], [0], [0], [1], [0, 0, 1, 1], [], []>} : vector<16x128xbf16>, vector<128x128xbf16>, vector<16x128xf32> -> vector<16x128xf32>
    %c0_16 = arith.constant 0 : index
    %c0_17 = arith.constant 0 : index
    %c0_18 = arith.constant 0 : index
    %21 = vector.load %arg7[%c0_16, %c0_17, %c0_18] : memref<1x1x128xf32, #tpu.memory_space<vmem>>, vector<1x1x128xf32>
    %22 = vector.shape_cast %21 : vector<1x1x128xf32> to vector<1x128xf32>
    %23 = vector.broadcast %22 : vector<1x128xf32> to vector<16x128xf32>
    %24 = arith.addf %20, %23 : vector<16x128xf32>
    %cst_19 = arith.constant 0.000000e+00 : f32
    %25 = vector.broadcast %cst_19 : f32 to vector<16x128xf32>
    %26 = arith.maximumf %24, %25 : vector<16x128xf32>
    %27 = tpu.iota {dimensions = array<i32: 0>} : vector<16x1xi32>
    %c16_i32 = arith.constant 16 : i32
    %28 = vector.broadcast %c16_i32 : i32 to vector<16x1xi32>
    %29 = arith.cmpi slt, %27, %28 : vector<16x1xi32>
    %30 = arith.extui %29 : vector<16x1xi1> to vector<16x1xi32>
    %31 = arith.sitofp %30 : vector<16x1xi32> to vector<16x1xf32>
    %32 = vector.broadcast %31 : vector<16x1xf32> to vector<16x128xf32>
    %33 = arith.mulf %26, %32 : vector<16x128xf32>
    %cst_20 = arith.constant dense<0.000000e+00> : vector<128xf32>
    %34 = vector.multi_reduction <add>, %33, %cst_20 [0] : vector<16x128xf32> to vector<128xf32>
    %35 = vector.shape_cast %34 : vector<128xf32> to vector<1x128xf32>
    %cst_21 = arith.constant 6.250000e-02 : f32
    %36 = vector.broadcast %cst_21 : f32 to vector<1x128xf32>
    %37 = arith.mulf %35, %36 : vector<1x128xf32>
    %38 = arith.mulf %33, %33 : vector<16x128xf32>
    %cst_22 = arith.constant dense<0.000000e+00> : vector<128xf32>
    %39 = vector.multi_reduction <add>, %38, %cst_22 [0] : vector<16x128xf32> to vector<128xf32>
    %40 = vector.shape_cast %39 : vector<128xf32> to vector<1x128xf32>
    %cst_23 = arith.constant 6.250000e-02 : f32
    %41 = vector.broadcast %cst_23 : f32 to vector<1x128xf32>
    %42 = arith.mulf %40, %41 : vector<1x128xf32>
    %43 = arith.mulf %37, %37 : vector<1x128xf32>
    %44 = arith.subf %42, %43 : vector<1x128xf32>
    %cst_24 = arith.constant 0.000000e+00 : f32
    %45 = vector.broadcast %cst_24 : f32 to vector<1x128xf32>
    %46 = arith.maximumf %44, %45 : vector<1x128xf32>
    %c0_25 = arith.constant 0 : index
    %c0_26 = arith.constant 0 : index
    %c0_27 = arith.constant 0 : index
    %47 = vector.load %arg8[%c0_25, %c0_26, %c0_27] : memref<1x1x128xf32, #tpu.memory_space<vmem>>, vector<1x1x128xf32>
    %48 = vector.shape_cast %47 : vector<1x1x128xf32> to vector<1x128xf32>
    %cst_28 = arith.constant 9.99999974E-6 : f32
    %49 = vector.broadcast %cst_28 : f32 to vector<1x128xf32>
    %50 = arith.addf %46, %49 : vector<1x128xf32>
    %51 = math.rsqrt %50 : vector<1x128xf32>
    %52 = arith.mulf %48, %51 : vector<1x128xf32>
    %c0_29 = arith.constant 0 : index
    %c0_30 = arith.constant 0 : index
    %c0_31 = arith.constant 0 : index
    %53 = vector.load %arg9[%c0_29, %c0_30, %c0_31] : memref<1x1x128xf32, #tpu.memory_space<vmem>>, vector<1x1x128xf32>
    %54 = vector.shape_cast %53 : vector<1x1x128xf32> to vector<1x128xf32>
    %55 = arith.mulf %37, %52 : vector<1x128xf32>
    %56 = arith.subf %54, %55 : vector<1x128xf32>
    %57 = vector.broadcast %52 : vector<1x128xf32> to vector<16x128xf32>
    %58 = arith.mulf %26, %57 : vector<16x128xf32>
    %59 = vector.broadcast %56 : vector<1x128xf32> to vector<16x128xf32>
    %60 = arith.addf %58, %59 : vector<16x128xf32>
    %c0_32 = arith.constant 0 : index
    %c0_33 = arith.constant 0 : index
    %61 = vector.load %arg12[%c0_32, %c0_33] : memref<16x128xf32, #tpu.memory_space<vmem>>, vector<16x128xf32>
    tpu.vector_store %arg12[%c0_32, %c0_33], %60 {strides = array<i32>} : memref<16x128xf32, #tpu.memory_space<vmem>>, vector<16x128xf32>,
    %c0_34 = arith.constant 0 : index
    %c0_35 = arith.constant 0 : index
    %62 = vector.load %arg10[%c0_34, %c0_35] : memref<16x128xf32, #tpu.memory_space<vmem>>, vector<16x128xf32>
    tpu.vector_store %arg10[%c0_34, %c0_35], %60 {strides = array<i32>} : memref<16x128xf32, #tpu.memory_space<vmem>>, vector<16x128xf32>,
    %c0_36 = arith.constant 0 : index
    %c0_37 = arith.constant 0 : index
    %63 = vector.load %arg3[%c0_36, %c0_37] : memref<8x16xbf16, #tpu.memory_space<vmem>>, vector<8x16xbf16>
    %64 = arith.truncf %60 : vector<16x128xf32> to vector<16x128xbf16>
    %cst_38 = arith.constant dense<0.000000e+00> : vector<8x128xf32>
    %65 = tpu.matmul %63, %64, %cst_38 {dimension_numbers = #tpu.dot_dimension_numbers<[1], [0], [0], [1], [0, 0, 1, 1], [], []>} : vector<8x16xbf16>, vector<16x128xbf16>, vector<8x128xf32> -> vector<8x128xf32>
    %c0_39 = arith.constant 0 : index
    %c0_40 = arith.constant 0 : index
    %66 = vector.load %arg11[%c0_39, %c0_40] : memref<8x128xf32, #tpu.memory_space<vmem>>, vector<8x128xf32>
    tpu.vector_store %arg11[%c0_39, %c0_40], %65 {strides = array<i32>} : memref<8x128xf32, #tpu.memory_space<vmem>>, vector<8x128xf32>,
    return
  }
  func.func @transform_0(%arg0: i32) -> (i32, i32) {
    %c0_i32 = arith.constant 0 : i32
    %c0_i32_0 = arith.constant 0 : i32
    %c0_i32_1 = arith.constant 0 : i32
    return %c0_i32, %c0_i32_0 : i32, i32
  }
  func.func @transform_1(%arg0: i32) -> (i32, i32) {
    %c0_i32 = arith.constant 0 : i32
    %c0_i32_0 = arith.constant 0 : i32
    %c0_i32_1 = arith.constant 0 : i32
    return %c0_i32, %c0_i32_0 : i32, i32
  }
  func.func @transform_2(%arg0: i32) -> (i32, i32) {
    %c0_i32 = arith.constant 0 : i32
    %c0_i32_0 = arith.constant 0 : i32
    %c0_i32_1 = arith.constant 0 : i32
    return %c0_i32, %c0_i32_0 : i32, i32
  }
  func.func @transform_3(%arg0: i32) -> (i32, i32, i32) {
    %c0_i32 = arith.constant 0 : i32
    %c0_i32_0 = arith.constant 0 : i32
    %c0_i32_1 = arith.constant 0 : i32
    return %arg0, %c0_i32, %c0_i32_0 : i32, i32, i32
  }
  func.func @transform_4(%arg0: i32) -> (i32, i32, i32) {
    %c0_i32 = arith.constant 0 : i32
    %c0_i32_0 = arith.constant 0 : i32
    %c0_i32_1 = arith.constant 0 : i32
    return %arg0, %c0_i32, %c0_i32_0 : i32, i32, i32
  }
  func.func @transform_5(%arg0: i32) -> (i32, i32, i32) {
    %c0_i32 = arith.constant 0 : i32
    %c0_i32_0 = arith.constant 0 : i32
    %c0_i32_1 = arith.constant 0 : i32
    return %arg0, %c0_i32, %c0_i32_0 : i32, i32, i32
  }
  func.func @transform_6(%arg0: i32) -> (i32, i32, i32) {
    %c0_i32 = arith.constant 0 : i32
    %c0_i32_0 = arith.constant 0 : i32
    %c0_i32_1 = arith.constant 0 : i32
    return %arg0, %c0_i32, %c0_i32_0 : i32, i32, i32
  }
  func.func @transform_7(%arg0: i32) -> (i32, i32, i32) {
    %c0_i32 = arith.constant 0 : i32
    %c0_i32_0 = arith.constant 0 : i32
    %c0_i32_1 = arith.constant 0 : i32
    return %arg0, %c0_i32, %c0_i32_0 : i32, i32, i32
  }
  func.func @transform_8(%arg0: i32) -> (i32, i32, i32) {
    %c0_i32 = arith.constant 0 : i32
    %c0_i32_0 = arith.constant 0 : i32
    %c0_i32_1 = arith.constant 0 : i32
    return %arg0, %c0_i32, %c0_i32_0 : i32, i32, i32
  }
  func.func @transform_9(%arg0: i32) -> (i32, i32) {
    %c0_i32 = arith.constant 0 : i32
    %c0_i32_0 = arith.constant 0 : i32
    return %c0_i32, %arg0 : i32, i32
  }
  func.func @transform_10(%arg0: i32) -> (i32, i32) {
    %c0_i32 = arith.constant 0 : i32
    %c0_i32_0 = arith.constant 0 : i32
    return %c0_i32, %arg0 : i32, i32
  }
}

</mosaic_0001>

<bundles_post_ra>
// kernel: tpu_custom_call.1
= control target key start
LH: loop header
LB: loop body
LE: loop exit
PB: predicated region body
PF: predicated region fallthrough
CT: control target
= control target key end

     0   :  { %s2055_s0 = inlined_call_operand.hbm [shape: f32[16,128], index: 0, kind: input, shape index: {}]   ;;  %s2056_s1 = inlined_call_operand.hbm [shape: bf16[16,16], index: 1, kind: input, shape index: {}]   ;;  %s2057_s2 = inlined_call_operand.vmem [shape: bf16[8,16], index: 2, kind: input, shape index: {}]   ;;  %s2058_s3 = inlined_call_operand.hbm [shape: bf16[3,128,128], index: 3, kind: input, shape index: {}]   ;;  %s2059_s4 = inlined_call_operand.vmem [shape: f32[3,1,128], index: 4, kind: input, shape index: {}]   ;;  %s2060_s5 = inlined_call_operand.hbm [shape: bf16[3,128,128], index: 5, kind: input, shape index: {}]   ;;  %s2061_s6 = inlined_call_operand.vmem [shape: f32[3,1,128], index: 6, kind: input, shape index: {}]   ;;  %s2062_s7 = inlined_call_operand.vmem [shape: f32[3,1,128], index: 7, kind: input, shape index: {}]   ;;  %s2063_s8 = inlined_call_operand.vmem [shape: f32[3,1,128], index: 8, kind: input, shape index: {}]   ;;  %s2064_s9 = inlined_call_operand.hbm [shape: f32[16,384], index: 9, kind: output, shape index: {0}]   ;;  %s2065_s10 = inlined_call_operand.hbm [shape: f32[8,384], index: 10, kind: output, shape index: {1}]  }
   0x1   :  { %2082 = sst [smem:[#allocation23_spill]] %s2055_s0 }
   0x2   :  { %2083 = sst [smem:[#allocation24_spill]] %s2057_s2 }
   0x3   :  { %2084 = sst [smem:[#allocation25_spill]] %s2058_s3 }
   0x4   :  { %2085 = sst [smem:[#allocation26_spill]] %s2064_s9 }
   0x5   :  { %2086 = sst [smem:[#allocation27_spill]] %s2065_s10 }
   0x6   :  { %16 = vsyncpa [#allocation4], 0 }
   0x7   :  { %17 = vsyncpa [#allocation7], 0 }
   0x8   :  { %18 = vsyncpa [#allocation5], 0 }
   0x9   :  { %20 = vsyncpa [#allocation5 + $0x1], 0 }
   0xa   :  { %21 = vsyncpa [#allocation12], 0 }
   0xb   :  { %23 = vsyncpa [#allocation12 + $0x1], 0  ;;  %s1640_s13 = smov 0   ;;  %s1642_s14 = smov 0  }
   0xc   :  { %s1644_s15 = smov 0   ;;  %s1646_s16 = smov 0  }
   0xd LB: > { %2087 = sst [smem:[#allocation18_spill]] %s1556_s13  ;;  %s1661_s17 = sadd.s32 4294967295, %s1568_s16   ;;  %s1568_s16 = sphi %s1646_s16, %s2123_s16   ;;  %s1564_s15 = sphi %s1644_s15, %s2125_s15   ;;  %s1560_s14 = sphi %s1642_s14, %s2127_s14   ;;  %s1556_s13 = sphi %s1640_s13, %s2126_s13  }
   0xe   : > { %2088 = sst [smem:[#allocation19_spill]] %s1564_s15  ;;  %s1119_s18 = sadd.s32 4294967294, %s1568_s16  }
   0xf   : > { %s1665_s19 = sadd.s32 1, %s1568_s16   ;;  %s99_s20 = sadd.s32 1, %s1564_s15 }
  0x10   : > { %2089 = sst [smem:[#allocation20_spill]] %s1665_s19  ;;  %s96_s21 = ssub.s32 %s1568_s16, %s1665_s19 }
  0x11   : > { %p106_p0 = scmp.ne.s32.totalorder %s1564_s15, %s1560_s14  ;;  %p97_p1 = scmp.eq.s32.totalorder %s96_s21, 0 }
  0x12   : > { %p107_p2 = scmp.eq.s32.totalorder %s1568_s16, 0  ;;  %p112_p3 = scmp.ne.s32.totalorder %s1560_s14, %s1556_s13 }
  0x13   : > { %p2068_p4 = scmp.eq.s32.totalorder %s1661_s17, 0  ;;  %p266_p7 = scmp.eq.s32.totalorder %s1661_s17, 2 }
  0x14   : > { %s1677_s22 = scalar_select %p97_p1, %s1564_s15, %s99_s20  }
  0x15   : > { %p1679_p5 = por %p107_p2, %p106_p0  ;;  %p1685_p6 = por %p2068_p4, %p112_p3 }
  0x16   : > { %2090 = sst [smem:[#allocation21_spill]] %s1677_s22  ;;  %p272_p8 = scmp.eq.s32.totalorder %s1119_s18, 2 }
  0x17   : > { %s2091_s23 = scalar_select %p1679_p5, 1, 0 }
  0x18   : > { %s2092_s24 = scalar_select %p1685_p6, 1, 0 }
  0x19   : > { %p1120_p9 = scmp.ge.s32.totalorder %s1568_s16, 1  ;;  %p305_p10 = scmp.lt.s32.totalorder %s1568_s16, 4 }
  0x1a   : > { %p1692_p11 = por %p266_p7, %p106_p0  ;;  %p1696_p12 = por %p272_p8, %p112_p3 }
  0x1b   : > { %p1700_p13 = pnand %p1120_p9, %p305_p10  ;;  %s1570_s28 = smov [#allocation3]  }
  0x1c   : > { %s2093_s25 = scalar_select %p1692_p11, 1, 0 }
  0x1d   : > { %s2094_s26 = scalar_select %p1696_p12, 1, 0 }
  0x1e   : > { %s2096_s27 = scalar_select %p1700_p13, 1, 0 }
  0x1f   : > { %2095 = sst [smem:[#allocation22_spill]] %s2094_s26  ;;  %p1257_p2 = pneg %p1700_p13 }
  0x20   : > { %s317_s29 = sshll.u32 %s1570_s28, 4  ;;  %s2098_s0 = sld [smem:[#allocation23_spill]]  ;;  %s318_s29 = int_to_ptr.vmem [resolvable:$true] %s317_s29 }
  0x21   : > { %p1709_p0 = pnand %p1257_p2, %p2068_p4 }
  0x23   : > { %p2076_p8 = pneg %p1709_p0 }
  0x26   : > { %s1346_s18 = scalar_lea.hbm %s2098_s0, 256 }
  0x27   : > { %p1347_p7 = scmp.ne.s32.totalorder %s2098_s0, %s1346_s18  ;;  %p1353_p2 = scmp.lt.u32.totalorder %s1346_s18, %s2098_s0 }
  0x29   : > { %p1349_p9 = pnand %p2076_p8, %p1347_p7 }
  0x2b   : > { %p1350_p10 = pneg %p1349_p9 }
  0x2d   : > { %p1355_p1 = pnand %p1353_p2, %p1350_p10 }
  0x2f   : > { %1358 = shalt.err (!%p1355_p1)
}
  0x30   : > { %s1359_s19 = scalar_lea.vmem %s318_s29, 256  ;;  %p1367_p11 = scmp.lt.s32.totalorder %s318_s29, %s318_s29 }
  0x31   : > { %p1360_p4 = scmp.ne.s32.totalorder %s318_s29, %s1359_s19  ;;  %p1368_p6 = scmp.lt.s32.totalorder %s1359_s19, %s1359_s19 }
  0x33   : > { %p1362_p3 = pnand %p1360_p4, %p2076_p8  ;;  %p1369_p13 = por %p1368_p6, %p1367_p11 }
  0x35   : > { %p1363_p12 = pneg %p1362_p3 }
  0x37   : > { %p1370_p5 = pnand %p1369_p13, %p1363_p12 }
  0x39   : > { %1373 = shalt.err (!%p1370_p5)
}
  0x3a   : > { %s1571_s11 = smov 128   ;;  %s1572_s22 = smov 8  }
  0x3b   : > { %1260 = dma.hbm_to_vmem [thread:$0]  (!%p1709_p0), %s2098_s0, 256, %s318_s29, [#allocation4], %s1571_s11, %s1571_s11, %s1572_s22  }
  0x3c   : > { %p2099_p4 = scmp.ne.s32.totalorder %s2091_s23, 0  ;;  %p2100_p1 = scmp.lt.s32.totalorder %s1568_s16, 3 }
  0x3d   : > { %s347_s20 = sand.u32 1, %s1568_s16   ;;  %s349_s21 = sand.u32 1, %s1564_s15  }
  0x3e   : > { %p1740_p3 = pnand %p2100_p1, %p2099_p4  ;;  %s1746_s28 = sshll.u32 %s349_s21, 6 }
  0x3f   : > { %s2075_s26 = sshll.u32 %s1568_s16, 10  ;;  %s2102_s3 = sld [smem:[#allocation25_spill]] }
  0x40   : > { %s2101_s19 = scalar_select %p1740_p3, 1, 0 }
  0x41   : > { %s351_s23 = scalar_lea.vmem [#allocation8], %s1746_s28  ;;  %s1759_s11 = scalar_lea.sflag [#allocation4], %s347_s20 }
  0x42   : > { %s358_s29 = sshll.u32 %s351_s23, 4  ;;  %p2079_p6 = pneg %p1740_p3  ;;  %s1757_s29 = int_to_ptr.vmem [resolvable:$true] %s358_s29 }
  0x45   : > { %s1754_s12 = scalar_lea.hbm %s2102_s3, %s2075_s26  ;;  %s1379_s18 = scalar_lea.hbm %s2102_s3, 3072 }
  0x46   : > { %s1374_s22 = scalar_lea.hbm %s1754_s12, 1024  ;;  %p1380_p13 = scmp.lt.u32.totalorder %s1754_s12, %s2102_s3 }
  0x47   : > { %p1375_p5 = scmp.ne.s32.totalorder %s1754_s12, %s1374_s22  ;;  %p1381_p7 = scmp.lt.u32.totalorder %s1379_s18, %s1374_s22 }
  0x48   : > { %p1383_p10 = scmp.lt.u32.totalorder %s1374_s22, %s1754_s12 }
  0x49   : > { %p1377_p11 = pnand %p2079_p6, %p1375_p5  ;;  %p1382_p9 = por %p1381_p7, %p1380_p13 }
  0x4b   : > { %p1378_p12 = pneg %p1377_p11  ;;  %p1384_p2 = por %p1383_p10, %p1382_p9 }
  0x4d   : > { %p1385_p4 = pnand %p1384_p2, %p1378_p12 }
  0x4f   : > { %1388 = shalt.err (!%p1385_p4)
}
  0x50   : > { %s1389_s20 = scalar_lea.vmem %s1757_s29, 1024  ;;  %s1573_s23 = smov [#allocation8]  }
  0x51   : > { %p1390_p1 = scmp.ne.s32.totalorder %s1757_s29, %s1389_s20  ;;  %s1394_s10 = sshll.u32 %s1573_s23, 4  ;;  %s1395_s10 = int_to_ptr.vmem [resolvable:$false] %s1394_s10 }
  0x52   : > { %s1396_s26 = scalar_lea.vmem %s1395_s10, 2048  ;;  %p1397_p8 = scmp.lt.s32.totalorder %s1757_s29, %s1395_s10 }
  0x53   : > { %p1392_p5 = pnand %p1390_p1, %p2079_p6  ;;  %p1398_p13 = scmp.lt.s32.totalorder %s1396_s26, %s1389_s20 }
  0x55   : > { %p1393_p11 = pneg %p1392_p5  ;;  %p1399_p7 = por %p1398_p13, %p1397_p8 }
  0x57   : > { %p1400_p9 = pnand %p1399_p7, %p1393_p11 }
  0x59   : > { %1403 = shalt.err (!%p1400_p9)
}
  0x5a   : > { %s1574_s22 = smov 64   ;;  %s1575_s13 = smov 4  }
  0x5b   : > { %1267 = dma.hbm_to_vmem [thread:$0]  (!%p1740_p3), %s1754_s12, 1024, %s1757_s29, %s1759_s11, %s1574_s22, %s1574_s22, %s1575_s13  }
  0x5c   : > { %s1576_s18 = smov [#allocation6]   ;;  %s2103_s20 = sshll.u32 %s1568_s16, 10 }
  0x5d   : > { %s330_s21 = sshll.u32 %s1576_s18, 4  ;;  %s1795_s26 = scalar_lea.hbm %s2060_s5, %s2103_s20  ;;  %s331_s21 = int_to_ptr.vmem [resolvable:$true] %s330_s21 }
  0x5e   : > { %s1404_s15 = scalar_lea.hbm %s2056_s1, 128  ;;  %p2104_p12 = pneg %p1709_p0 }
  0x5f   : > { %p1405_p8 = scmp.ne.s32.totalorder %s2056_s1, %s1404_s15  ;;  %p1411_p4 = scmp.lt.u32.totalorder %s1404_s15, %s2056_s1 }
  0x61   : > { %p1407_p10 = pnand %p1405_p8, %p2104_p12 }
  0x63   : > { %p1408_p2 = pneg %p1407_p10 }
  0x65   : > { %p1413_p1 = pnand %p1411_p4, %p1408_p2 }
  0x67   : > { %1416 = shalt.err (!%p1413_p1)
}
  0x68   : > { %s1417_s18 = scalar_lea.vmem %s331_s21, 128  ;;  %p2105_p11 = pmov %p2104_p12 }
  0x69   : > { %p1418_p5 = scmp.ne.s32.totalorder %s331_s21, %s1417_s18  ;;  %p1425_p9 = scmp.lt.s32.totalorder %s331_s21, %s331_s21 }
  0x6a   : > { %p1426_p6 = scmp.lt.s32.totalorder %s1417_s18, %s1417_s18 }
  0x6b   : > { %p1420_p13 = pnand %p1418_p5, %p2105_p11 }
  0x6c   : > { %p1427_p3 = por %p1426_p6, %p1425_p9 }
  0x6d   : > { %p1421_p7 = pneg %p1420_p13 }
  0x6f   : > { %p1428_p8 = pnand %p1427_p3, %p1421_p7 }
  0x71   : > { %1431 = shalt.err (!%p1428_p8)
}
  0x72   : > { %1263 = dma.hbm_to_vmem [thread:$0]  (!%p1709_p0), %s2056_s1, 128, %s331_s21, [#allocation7], %s1574_s22, %s1574_s22, %s1575_s13  }
  0x73   : > { %s378_s3 = scalar_lea.vmem [#allocation9], %s1746_s28  ;;  %s1432_s15 = scalar_lea.hbm %s1795_s26, 1024 }
  0x74   : > { %s385_s9 = sshll.u32 %s378_s3, 4  ;;  %p1433_p3 = scmp.ne.s32.totalorder %s1795_s26, %s1432_s15  ;;  %s1821_s9 = int_to_ptr.vmem [resolvable:$true] %s385_s9 }
  0x75   : > { %p2106_p6 = scmp.ne.s32.totalorder %s2101_s19, 0  ;;  %s1437_s23 = scalar_lea.hbm %s2060_s5, 3072 }
  0x76   : > { %p1438_p4 = scmp.lt.u32.totalorder %s1795_s26, %s2060_s5  ;;  %p1439_p1 = scmp.lt.u32.totalorder %s1437_s23, %s1432_s15 }
  0x77   : > { %p2107_p12 = pneg %p2106_p6  ;;  %p1441_p5 = scmp.lt.u32.totalorder %s1432_s15, %s1795_s26 }
  0x78   : > { %p1440_p0 = por %p1439_p1, %p1438_p4 }
  0x79   : > { %p1435_p10 = pnand %p1433_p3, %p2107_p12 }
  0x7a   : > { %p1442_p11 = por %p1441_p5, %p1440_p0 }
  0x7b   : > { %p1436_p2 = pneg %p1435_p10 }
  0x7d   : > { %p1443_p13 = pnand %p1442_p11, %p1436_p2 }
  0x7f   : > { %1446 = shalt.err (!%p1443_p13)
}
  0x80   : > { %s1447_s28 = scalar_lea.vmem %s1821_s9, 1024  ;;  %p2108_p9 = pmov %p2107_p12 }
  0x81   : > { %p1448_p7 = scmp.ne.s32.totalorder %s1821_s9, %s1447_s28  ;;  %s1577_s21 = smov [#allocation9]  }
  0x82   : > { %s1452_s29 = sshll.u32 %s1577_s21, 4  ;;  %s1453_s29 = int_to_ptr.vmem [resolvable:$false] %s1452_s29 }
  0x83   : > { %p1450_p8 = pnand %p1448_p7, %p2108_p9  ;;  %s1454_s18 = scalar_lea.vmem %s1453_s29, 2048 }
  0x84   : > { %p1455_p12 = scmp.lt.s32.totalorder %s1821_s9, %s1453_s29  ;;  %p1456_p10 = scmp.lt.s32.totalorder %s1454_s18, %s1447_s28 }
  0x85   : > { %p1451_p3 = pneg %p1450_p8 }
  0x86   : > { %p1457_p4 = por %p1456_p10, %p1455_p12 }
  0x88   : > { %p1458_p1 = pnand %p1457_p4, %p1451_p3 }
  0x8a   : > { %1461 = shalt.err (!%p1458_p1)
}
  0x8b   : > { %1270 = dma.hbm_to_vmem [thread:$0]  (!%p2106_p6), %s1795_s26, 1024, %s1821_s9, %s1759_s11, %s1574_s22, %s1574_s22, %s1575_s13  }
  0x8c   : > { %p2109_p2 = scmp.ne.s32.totalorder %s2096_s27, 0 }
  0x8d   : > { %p2110_p0 = scmp.eq.s32.totalorder (!%p2109_p2), %s1661_s17, 0 }
  0x8e   : > { %415 = sbr.rel (%p2109_p2) target bundleno = 1109 (0x455), region = 56 }
  0x95   : > { %1535 = dma.done.wait (%p2110_p0), [#allocation4], 256   ;;  %p2111_p5 = pmov %p2110_p0 }
  0x96   : > { %p2112_p11 = pmov %p2110_p0 }
  0x97   : > { %1537 = vsyncadd (%p2111_p5), [#allocation4], 4294967040 }
  0x98   : > { %1539 = dma.done.wait (%p2112_p11), [#allocation7], 128   ;;  %p2113_p13 = pmov %p2110_p0 }
  0x99   : > { %s425_s19 = sand.u32 1, %s1661_s17   ;;  %s1862_s11 = sand.u32 1, %s1560_s14  }
  0x9a   : > { %1541 = vsyncadd (%p2113_p13), [#allocation7], 4294967168  ;;  %s1133_s27 = sshll.u32 %s1862_s11, 6  ;;  %s426_s22 = scalar_lea.sflag [#allocation4], %s425_s19 }
  0x9b   : > { %s1865_s13 = scalar_lea.vmem [#allocation8], %s1133_s27  ;;  %p2114_p6 = scmp.ne.s32.totalorder %s2092_s24, 0 }
  0x9d   : > { %1543 = dma.done.wait (%p2114_p6), %s426_s22, 2048  }
  0x9e   : > { %1545 = vsyncadd (%p2114_p6), %s426_s22, 4294965248  ;;  %s1135_s26 = sshll.u32 %s1862_s11, 4  ;;  %s1136_s0 = sshll.u32 %s1862_s11, 3 }
  0x9f   : > { %p497_p7 = scmp.lt.s32.totalorder %s1661_s17, 2  ;;  %s1893_s18 = scalar_lea.vmem [#allocation9], %s1133_s27 }
  0xa0   : > { %s1895_s19 = scalar_lea.vmem [#allocation10], %s1135_s26  ;;  %s1897_s22 = scalar_lea.vmem [#allocation11], %s1136_s0 }
  0xa1   : > { %s1875_s2 = scalar_select %p497_p7, %s1661_s17, 2 }
  0xa2   : > { %p2115_p9 = scmp.ne.s32.totalorder %s1661_s17, 0 }
  0xa3   : > { %s499_s15 = scalar_lea.vmem %s2059_s4, %s1875_s2  ;;  %s502_s20 = scalar_lea.vmem %s2061_s6, %s1875_s2  ;;  %v514_v0 = vld [vmem:[#allocation3] sm:$0xff] (!%p2115_p9)  ;;  %v515_v1 = vld [vmem:[#allocation3 + $0x8] sm:$0xff] (!%p2115_p9) }
  0xa4   : > { %s505_s12 = scalar_lea.vmem %s2062_s7, %s1875_s2  ;;  %s508_s29 = scalar_lea.vmem %s2063_s8, %s1875_s2  ;;  %516 = vst [vmem:[#allocation2] sm:$0xff] (!%p2115_p9), %v514_v0  ;;  %517 = vst [vmem:[#allocation2 + $0x8] sm:$0xff] (!%p2115_p9), %v515_v1 }
  0xa5   : > { %513 = sbr.rel (%p2115_p9) target bundleno = 172 (0xac), region = 76 }
  0xac PF: > { %v518_v2 = vld [vmem:[#allocation2] sm:$0xff]  ;;  %v519_v3 = vld [vmem:[#allocation2 + $0x8] sm:$0xff]  ;;  %v1578_v4 = vmov 0.0   ;;  %vm1579_vm0 = vmmov 0   ;;  %vm528_vm1 = vcmask 130048   ;;  %v1329_v8 = vld [vmem:[%s1865_s13 + $0x8] sm:$0xff]  }
  0xad   : > { %1189 = vmatprep.subr.bf16.mxu0 %v1578_v4  ;;  %v522_v5 = vpack.c.bf16 %v519_v3, %v518_v2  ;;  %1191 = vmatprep.mubr.msk.bf16.mxu0 %vm1579_vm0, %v1578_v4  ;;  %v1327_v6 = vld [vmem:[#allocation6] sm:$0xff]   ;;  %v1328_v7 = vld [vmem:[%s1865_s13] sm:$0xff]   ;;  %v1330_v9 = vld [vmem:[%s1865_s13 + $0x10] sm:$0xff]   ;;  %s1161_s23 = sshll.u32 %s1661_s17, 7  ;;  %s926_s10 = sshll.u32 %s1895_s19, 4  ;;  %s1979_s10 = int_to_ptr.vmem [resolvable:$true] %s926_s10 }
  0xae   : > { %1195 = vmatprep.subr.bf16.mxu1 %v1578_v4  ;;  %1211 = vmatprep.mubr.msk.bf16.mxu1 %vm1579_vm0, %v1578_v4  ;;  %v1331_v10 = vld [vmem:[%s1865_s13 + $0x18] sm:$0xff]   ;;  %v1332_v11 = vld [vmem:[%s1865_s13 + $0x20] sm:$0xff]   ;;  %v1333_v12 = vld [vmem:[%s1865_s13 + $0x28] sm:$0xff]   ;;  %s2117_s21 = sld [smem:[#allocation26_spill]]  ;;  %s1462_s27 = scalar_lea.vmem %s1979_s10, 256 }
  0xaf   : > { %1190 = vmatpush3.bf16.msra.mxu0 %v522_v5  ;;  %1196 = vmatpush3.bf16.msra.mxu1 %v1328_v7  ;;  %v1334_v13 = vld [vmem:[%s1865_s13 + $0x30] sm:$0xff]   ;;  %v1335_v14 = vld [vmem:[%s1865_s13 + $0x38] sm:$0xff]   ;;  %v1336_v15 = vld [vmem:[%s1893_s18] sm:$0xff]   ;;  %v843_v5 = vlaneseq  ;;  %p1463_p8 = scmp.ne.s32.totalorder %s1979_s10, %s1462_s27  ;;  %p2118_p3 = scmp.ne.s32.totalorder %s2093_s25, 0 }
  0xb0   : > { %1215 = vmatprep.subr.bf16.mxu0 %v1578_v4  ;;  %1197 = vmatprep.subr.bf16.mxu1 %v1578_v4  ;;  %v1337_v16 = vld [vmem:[%s1893_s18 + $0x8] sm:$0xff]   ;;  %v1338_v17 = vld [vmem:[%s1893_s18 + $0x10] sm:$0xff]   ;;  %v1339_v18 = vld [vmem:[%s1893_s18 + $0x18] sm:$0xff]   ;;  %s1580_s13 = smov [#allocation10]  }
  0xb1   : > { %v1340_v19 = vld [vmem:[%s1893_s18 + $0x20] sm:$0xff]   ;;  %v1341_v20 = vld [vmem:[%s1893_s18 + $0x28] sm:$0xff]   ;;  %v1342_v26 = vld [vmem:[%s1893_s18 + $0x30] sm:$0xff]   ;;  %p1464_p12 = pnand %p1463_p8, %p2118_p3  ;;  %s1466_s26 = sshll.u32 %s1580_s13, 4  ;;  %s1467_s26 = int_to_ptr.vmem [resolvable:$false] %s1466_s26 }
  0xb2   : > { %1192 = vmatmul.mubr.msk.bf16.vlgmr.msra.gmra.mrb[0].mxu0 %vm528_vm1, %v1327_v6  ;;  %v1343_v27 = vld [vmem:[%s1893_s18 + $0x38] sm:$0xff]   ;;  %v844_v6 = vshrl.u32 %v843_v5, 7  ;;  %s909_s18 = scalar_lea.sflag [#allocation5], %s1862_s11  ;;  %p1469_p4 = scmp.lt.s32.totalorder %s1979_s10, %s1467_s26 }
  0xb3   : > { %1231 = vmatprep.mubr.msk.bf16.mxu0 %vm1579_vm0, %v1578_v4  ;;  %1198 = vmatpush3.bf16.msra.mxu1 %v1329_v8  ;;  %v1140_v28 = vld [vmem:[%s499_s15] ss:$0 sm:$0xff]  ;;  %p1465_p10 = pneg %p1464_p12 }
  0xb4   : > { %1199 = vmatprep.subr.bf16.mxu1 %v1578_v4  ;;  %1216 = vmatpush3.bf16.msra.mxu0 %v1336_v15  ;;  %v1149_v38 = vld [vmem:[%s502_s20] ss:$0 sm:$0xff]  ;;  %v845_v8 = vsub.s32 0, %v844_v6  ;;  %s2116_s20 = sld [smem:[#allocation24_spill]] }
  0xb5   : > { %1217 = vmatprep.subr.bf16.mxu0 %v1578_v4  ;;  %v835_v7 = vld [vmem:[%s505_s12] sm:$0x1] }
  0xb7   : > { %1200 = vmatpush3.bf16.msra.mxu1 %v1330_v9 }
  0xb8   : > { %1201 = vmatprep.subr.bf16.mxu1 %v1578_v4  ;;  %1218 = vmatpush3.bf16.msra.mxu0 %v1337_v16 }
  0xb9   : > { %1219 = vmatprep.subr.bf16.mxu0 %v1578_v4 }
  0xbb   : > { %1202 = vmatpush3.bf16.msra.mxu1 %v1331_v10 }
  0xbc   : > { %1203 = vmatprep.subr.bf16.mxu1 %v1578_v4  ;;  %1220 = vmatpush3.bf16.msra.mxu0 %v1338_v17 }
  0xbd   : > { %1221 = vmatprep.subr.bf16.mxu0 %v1578_v4 }
  0xbf   : > { %1204 = vmatpush3.bf16.msra.mxu1 %v1332_v11  ;;  %v839_v11 = vld [vmem:[%s508_s29] sm:$0x1]  ;;  %s1977_s29 = scalar_lea.hbm %s2117_s21, %s1161_s23 }
  0xc0   : > { %1205 = vmatprep.subr.bf16.mxu1 %v1578_v4  ;;  %1222 = vmatpush3.bf16.msra.mxu0 %v1339_v18 }
  0xc1   : > { %1223 = vmatprep.subr.bf16.mxu0 %v1578_v4 }
  0xc3   : > { %1206 = vmatpush3.bf16.msra.mxu1 %v1333_v12 }
  0xc4   : > { %1207 = vmatprep.subr.bf16.mxu1 %v1578_v4  ;;  %1224 = vmatpush3.bf16.msra.mxu0 %v1340_v19 }
  0xc5   : > { %1225 = vmatprep.subr.bf16.mxu0 %v1578_v4 }
  0xc7   : > { %1208 = vmatpush3.bf16.msra.mxu1 %v1334_v13 }
  0xc8   : > { %1209 = vmatprep.subr.bf16.mxu1 %v1578_v4  ;;  %1226 = vmatpush3.bf16.msra.mxu0 %v1341_v20 }
  0xc9   : > { %1227 = vmatprep.subr.bf16.mxu0 %v1578_v4 }
  0xcb   : > { %1210 = vmatpush3.bf16.msra.mxu1 %v1335_v14 }
  0xcc   : > { %1235 = vmatprep.subr.bf16.mxu1 %v1578_v4  ;;  %1228 = vmatpush3.bf16.msra.mxu0 %v1342_v26 }
  0xcd   : > { %1229 = vmatprep.subr.bf16.mxu0 %v1578_v4 }
  0xd0   : > { %1230 = vmatpush3.bf16.msra.mxu0 %v1343_v27 }
 0x185   : > { %v566_v21 = vpop.f32.mrb[0].mxu0 }
 0x186   : > { %v1193_v22 = vpop.f32.mrb[1].mxu0 }
 0x187   : > { %v569_v23 = vpop.f32.mrb[2].mxu0 }
 0x188   : > { %v573_v24 = vpack.c.bf16 %v569_v23, %v566_v21  ;;  %v1194_v25 = vpop.f32.mrb[3].mxu0  ;;  %v862_v21 = vld [vmem:[%s2116_s20] sm:$0xf] }
 0x18a   : > { %1212 = vmatmul.mubr.bf16.vlgmr.msra.gmra.mrb[0].mxu1 %v573_v24 }
 0x18b   : > { %1237 = vmatprep.mubr.msk.bf16.mxu1 %vm1579_vm0, %v1578_v4 }
 0x25d   : > { %v679_v29 = vpop.f32.mrb[0].mxu1 }
 0x25e   : > { %v680_v30 = vadd.f32 %v1140_v28, %v679_v29  ;;  %v1213_v31 = vpop.f32.mrb[1].mxu1 }
 0x25f   : > { %v682_v32 = vpop.f32.mrb[2].mxu1 }
 0x260   : > { %v683_v33 = vadd.f32 %v1140_v28, %v682_v32  ;;  %v1214_v34 = vpop.f32.mrb[3].mxu1  ;;  %v686_v35 = vmax.f32 %v680_v30, 0.0 }
 0x262   : > { %v687_v36 = vmax.f32 %v683_v33, 0.0 }
 0x264   : > { %v688_v37 = vpack.c.bf16 %v687_v36, %v686_v35 }
 0x266   : > { %1232 = vmatmul.mubr.bf16.vlgmr.msra.gmra.mrb[4].mxu0 %v688_v37 }
 0x339   : > { %v794_v39 = vpop.f32.mrb[4].mxu0 }
 0x33a   : > { %v795_v40 = vadd.f32 %v1149_v38, %v794_v39  ;;  %v1233_v41 = vpop.f32.mrb[5].mxu0 }
 0x33b   : > { %v797_v42 = vpop.f32.mrb[6].mxu0 }
 0x33c   : > { %v801_v43 = vmax.f32 %v795_v40, 0.0  ;;  %v798_v44 = vadd.f32 %v1149_v38, %v797_v42  ;;  %v1234_v45 = vpop.f32.mrb[7].mxu0 }
 0x33e   : > { %v802_v46 = vmax.f32 %v798_v44, 0.0  ;;  %v822_v47 = vmul.f32 %v801_v43, %v801_v43 }
 0x340   : > { %v814_v48 = vadd.f32 %v802_v46, %v801_v43  ;;  %v823_v49 = vmul.f32 %v802_v46, %v802_v46 }
 0x342   : > { %v815_v50 = vrot.slane %v814_v48, 4  ;;  %v824_v51 = vadd.f32 %v823_v49, %v822_v47 }
 0x344   : > { %v816_v52 = vadd.f32 %v815_v50, %v814_v48  ;;  %v825_v53 = vrot.slane %v824_v51, 4 }
 0x346   : > { %v817_v54 = vrot.slane %v816_v52, 2  ;;  %v826_v55 = vadd.f32 %v825_v53, %v824_v51 }
 0x348   : > { %v818_v56 = vadd.f32 %v817_v54, %v816_v52  ;;  %v827_v57 = vrot.slane %v826_v55, 2 }
 0x34a   : > { %v819_v58 = vrot.slane %v818_v56, 1  ;;  %v828_v59 = vadd.f32 %v827_v57, %v826_v55 }
 0x34c   : > { %v820_v60 = vadd.f32 %v819_v58, %v818_v56  ;;  %v829_v61 = vrot.slane %v828_v59, 1 }
 0x34e   : > { %v821_v62 = vmul.f32 0.0625, %v820_v60  ;;  %v830_v63 = vadd.f32 %v829_v61, %v828_v59 }
 0x350   : > { %v831_v0 = vmul.f32 0.0625, %v830_v63  ;;  %v832_v1 = vmul.f32 %v821_v62, %v821_v62 }
 0x352   : > { %v833_v2 = vsub.f32 %v831_v0, %v832_v1 }
 0x354   : > { %v834_v3 = vmax.f32 %v833_v2, 0.0 }
 0x356   : > { %v836_v4 = vadd.f32 1e-05, %v834_v3 }
 0x358   : > { %1344 = vrsqrt.f32 %v836_v4 }
 0x362   : > { %v1345_v9 = vpop.eup %1344 }
 0x363   : > { %v838_v10 = vmul.f32 %v1345_v9, %v835_v7 }
 0x365   : > { %v840_v12 = vmul.f32 %v838_v10, %v821_v62  ;;  %v846_v13 = vrot.slane %v838_v10, %v845_v8 }
 0x367   : > { %v841_v14 = vsub.f32 %v839_v11, %v840_v12  ;;  %v848_v15 = vmul.f32 %v846_v13, %v801_v43  ;;  %v849_v16 = vmul.f32 %v846_v13, %v802_v46 }
 0x369   : > { %v854_v17 = vrot.slane %v841_v14, %v845_v8 }
 0x36b   : > { %v856_v18 = vadd.f32 %v854_v17, %v848_v15  ;;  %v857_v19 = vadd.f32 %v854_v17, %v849_v16 }
 0x36d   : > { %858 = vst [vmem:[#allocation2] sm:$0xff] %v856_v18  ;;  %859 = vst [vmem:[#allocation2 + $0x8] sm:$0xff] %v857_v19  ;;  %v863_v20 = vpack.c.bf16 %v857_v19, %v856_v18 }
 0x36e   : > { %861 = vst [vmem:[%s1895_s19 + $0x8] sm:$0xff] %v857_v19  ;;  %860 = vst [vmem:[%s1895_s19] sm:$0xff] %v856_v18  ;;  %s1468_s19 = scalar_lea.vmem %s1467_s26, 512 }
 0x36f   : > { %1236 = vmatpush3.bf16.msra.mxu1 %v863_v20  ;;  %p1470_p1 = scmp.lt.s32.totalorder %s1468_s19, %s1462_s27 }
 0x371   : > { %p1471_p2 = por %p1470_p1, %p1469_p4 }
 0x372   : > { %1238 = vmatmul.mubr.msk.bf16.vlgmr.msra.gmra.mrb[4].mxu1 %vm528_vm1, %v862_v21 }
 0x373   : > { %p1472_p0 = pnand %p1471_p2, %p1465_p10 }
 0x375   : > { %1475 = shalt.err (!%p1472_p0)
}
 0x376   : > { %s1476_s0 = scalar_lea.hbm %s1977_s29, 256  ;;  %s1480_s15 = scalar_lea.hbm %s2117_s21, 768 }
 0x377   : > { %p1477_p5 = scmp.ne.s32.totalorder %s1977_s29, %s1476_s0  ;;  %p1481_p6 = scmp.lt.u32.totalorder %s1977_s29, %s2117_s21 }
 0x378   : > { %p1482_p7 = scmp.lt.u32.totalorder %s1480_s15, %s1476_s0  ;;  %p1484_p8 = scmp.lt.u32.totalorder %s1476_s0, %s1977_s29 }
 0x379   : > { %p1478_p11 = pnand %p1477_p5, %p2118_p3 }
 0x37a   : > { %p1483_p9 = por %p1482_p7, %p1481_p6 }
 0x37b   : > { %p1479_p13 = pneg %p1478_p11 }
 0x37c   : > { %p1485_p12 = por %p1484_p8, %p1483_p9 }
 0x37e   : > { %p1486_p10 = pnand %p1485_p12, %p1479_p13 }
 0x380   : > { %1489 = shalt.err (!%p1486_p10)
}
 0x381   : > { %s1581_s24 = smov 128   ;;  %s1582_s20 = smov 384  }
 0x382   : > { %s1583_s12 = smov 8   ;;  %s942_s28 = sshll.u32 %s1897_s22, 4  ;;  %s2013_s28 = int_to_ptr.vmem [resolvable:$true] %s942_s28 }
 0x383   : > { %1253 = dma.vmem_to_hbm [thread:$0]  (%p2118_p3), %s1979_s10, 256, %s1977_s29, %s909_s18, %s1581_s24, %s1582_s20, %s1583_s12  }
 0x384   : > { %s2119_s26 = sld [smem:[#allocation27_spill]]  ;;  %s914_s0 = scalar_lea.sflag [#allocation12], %s1862_s11 }
 0x385   : > { %s1490_s3 = scalar_lea.vmem %s2013_s28, 128  ;;  %s1584_s17 = smov [#allocation11]  }
 0x386   : > { %p1491_p4 = scmp.ne.s32.totalorder %s2013_s28, %s1490_s3  ;;  %s1494_s10 = sshll.u32 %s1584_s17, 4  ;;  %s1495_s10 = int_to_ptr.vmem [resolvable:$false] %s1494_s10 }
 0x387   : > { %p1497_p0 = scmp.lt.s32.totalorder %s2013_s28, %s1495_s10 }
 0x388   : > { %p1492_p1 = pnand %p1491_p4, %p2118_p3 }
 0x38a   : > { %s2011_s19 = scalar_lea.hbm %s2119_s26, %s1161_s23  ;;  %p1493_p2 = pneg %p1492_p1 }
 0x38b   : > { %s1496_s23 = scalar_lea.vmem %s1495_s10, 256 }
 0x38c   : > { %p1498_p5 = scmp.lt.s32.totalorder %s1496_s23, %s1490_s3 }
 0x38e   : > { %p1499_p11 = por %p1498_p5, %p1497_p0 }
 0x390   : > { %p1500_p13 = pnand %p1499_p11, %p1493_p2 }
 0x445   : > { %v901_v22 = vpop.f32.mrb[4].mxu1 }
 0x446   : > { %907 = vst [vmem:[%s1897_s22] sm:$0xff] %v901_v22  ;;  %v1239_v23 = vpop.f32.mrb[5].mxu1 }
 0x447   : > { %v904_v24 = vpop.f32.mrb[6].mxu1 }
 0x448   : > { %1503 = shalt.err (!%p1500_p13)
}
 0x449   : > { %s1504_s11 = scalar_lea.hbm %s2011_s19, 128  ;;  %s1508_s18 = scalar_lea.hbm %s2119_s26, 384 }
 0x44a   : > { %p1505_p6 = scmp.ne.s32.totalorder %s2011_s19, %s1504_s11  ;;  %p1509_p8 = scmp.lt.u32.totalorder %s2011_s19, %s2119_s26 }
 0x44b   : > { %p1510_p12 = scmp.lt.u32.totalorder %s1508_s18, %s1504_s11  ;;  %p1512_p4 = scmp.lt.u32.totalorder %s1504_s11, %s2011_s19 }
 0x44c   : > { %p1506_p7 = pnand %p1505_p6, %p2118_p3 }
 0x44d   : > { %p1511_p10 = por %p1510_p12, %p1509_p8 }
 0x44e   : > { %p1507_p9 = pneg %p1506_p7 }
 0x44f   : > { %p1513_p1 = por %p1512_p4, %p1511_p10 }
 0x451   : > { %p1514_p2 = pnand %p1513_p1, %p1507_p9 }
 0x453   : > { %1517 = shalt.err (!%p1514_p2)
}
 0x454   : > { %1254 = dma.vmem_to_hbm [thread:$0]  (%p2118_p3), %s2013_s28, 128, %s2011_s19, %s914_s0   ;;  %v1240_v25 = vpop.f32.mrb[7].mxu1 }
 0x455 PF: > { %s2120_s30 = sld [smem:[#allocation18_spill]]  ;;  %s2121_s2 = sld [smem:[#allocation22_spill]] }
 0x456   : > { %p1283_p0 = scmp.ge.s32.totalorder %s1568_s16, 2 }
 0x45b   : > { %s954_s24 = sand.u32 1, %s2120_s30   ;;  %p2122_p5 = scmp.ne.s32.totalorder %s2121_s2, 0 }
 0x45c   : > { %s955_s20 = scalar_lea.sflag [#allocation5], %s954_s24 }
 0x45d   : > { %p1272_p11 = pnand %p1283_p0, %p2122_p5 }
 0x45f   : > { %1547 = dma.done.wait (!%p1272_p11), %s955_s20, 256  }
 0x460   : > { %1549 = vsyncadd (!%p1272_p11), %s955_s20, 4294967040  ;;  %s964_s12 = scalar_lea.sflag [#allocation12], %s954_s24 }
 0x461   : > { %1551 = dma.done.wait (!%p1272_p11), %s964_s12, 128  }
 0x462   : > { %1553 = vsyncadd (!%p1272_p11), %s964_s12, 4294967168  ;;  %s2123_s16 = sld [smem:[#allocation20_spill]]  ;;  %s2124_s25 = sld [smem:[#allocation19_spill]] }
 0x463   : > { %s2125_s15 = sld [smem:[#allocation21_spill]]  ;;  %s2126_s13 = smov %s1560_s14 }
 0x468   : > { %p26_p3 = scmp.ge.s32.totalorder %s2123_s16, 5   ;;  %s2127_s14 = smov %s2124_s25 }
 0x46a   :  { %28 = sbr.rel (!%p26_p3) target bundleno = 13 (0xd), region = 152 }
 0x471   :  { %969 = vsyncpa [#allocation4], 1 }
 0x472   :  { %971 = vsyncpa [#allocation4 + $0x1], 1 }
 0x473   :  { %972 = vsyncpa [#allocation7], 1 }
 0x474   :  { %973 = vsyncpa [#allocation5], 1 }
 0x475   :  { %975 = vsyncpa [#allocation5 + $0x1], 1 }
 0x476   :  { %976 = vsyncpa [#allocation12], 1 }
 0x477   :  { %978 = vsyncpa [#allocation12 + $0x1], 1 }

</bundles_post_ra>
